<compile_context>
chip_gen: v7x
topology: tpu7x:2x2x1
jax: 0.10.0
libtpu: 0.0.40
codegen_flags: <defaults>
</compile_context>

<pallas_src>
import functools

import jax
import jax.numpy as jnp
from jax import lax
from jax.experimental import pallas as pl
from jax.experimental.pallas import tpu as pltpu


def _round_up(x, m):
    return ((x + m - 1) // m) * m


def _lora_kernel(x_ref, at_ref, b_ref, o_ref, *, alpha, sub_tm):
    # x_ref : (tm, in_dim)    compute dtype (bf16)
    # at_ref: (rank, in_dim)  compute dtype  -- A pre-transposed, rank on sublanes
    # b_ref : (rank, tn)      compute dtype
    # o_ref : (tm, tn)        output dtype
    a_t = at_ref[...]
    b = b_ref[...]
    num_sub = x_ref.shape[0] // sub_tm

    def body(s, carry):
        r0 = pl.multiple_of(s * sub_tm, sub_tm)
        xs = x_ref[pl.ds(r0, sub_tm), :]
        # (sub_tm, in_dim) contracted with (rank, in_dim) over last dims
        # -> (sub_tm, rank), f32 accumulation on the MXU.
        xa = lax.dot_general(
            xs, a_t,
            dimension_numbers=(((1,), (1,)), ((), ())),
            preferred_element_type=jnp.float32,
        )
        out = jnp.dot(xa.astype(b.dtype), b, preferred_element_type=jnp.float32)
        o_ref[pl.ds(r0, sub_tm), :] = (alpha * out).astype(o_ref.dtype)
        return carry

    lax.fori_loop(0, num_sub, body, 0, unroll=True)


def lora_forward(x, A, B, alpha, *, tm=256, tn=512,
                 compute_dtype=jnp.bfloat16, interpret=False):
    """alpha * (x @ A @ B) with one fused Pallas kernel.

    x: (batch, in_dim), A: (in_dim, rank), B: (rank, out_dim).
    The (batch, rank) intermediate never touches HBM.
    """
    batch, in_dim = x.shape
    in_dim_a, rank = A.shape
    rank_b, out_dim = B.shape
    assert in_dim == in_dim_a and rank == rank_b
    out_dtype = x.dtype

    # ---- tile-size selection (adapts to small shapes, lane/sublane aligned) ----
    tm_eff = min(tm, _round_up(batch, 8))        # sublane-aligned batch tile
    tn_eff = min(tn, _round_up(out_dim, 128))    # lane-dense (128-mult) output tile
    sub_tm = min(128, tm_eff)                    # keeps (sub_tm, rank) in few vregs
    assert tm_eff % sub_tm == 0

    batch_p = _round_up(batch, tm_eff)
    out_p = _round_up(out_dim, tn_eff)

    # ---- layout & dtype plumbing at the boundary (cheap one-time XLA ops) ----
    xc = x.astype(compute_dtype)
    if batch_p != batch:
        xc = jnp.pad(xc, ((0, batch_p - batch), (0, 0)))
    at = A.T.astype(compute_dtype)               # (rank, in_dim): rank on sublanes
    bc = B.astype(compute_dtype)
    if out_p != out_dim:
        bc = jnp.pad(bc, ((0, 0), (0, out_p - out_dim)))

    grid = (batch_p // tm_eff, out_p // tn_eff)
    kernel = functools.partial(_lora_kernel, alpha=float(alpha), sub_tm=sub_tm)
    # NOTE: alpha is baked in as a compile-time constant (module hyperparameter);
    # pass it as an SMEM scalar instead if it must vary at runtime.

    out = pl.pallas_call(
        kernel,
        out_shape=jax.ShapeDtypeStruct((batch_p, out_p), out_dtype),
        grid_spec=pltpu.PrefetchScalarGridSpec(
            num_scalar_prefetch=0,
            grid=grid,
            in_specs=[
                # x: tile over batch rows, full in_dim (equal to the array dim).
                pl.BlockSpec((tm_eff, in_dim), lambda i, j: (i, 0)),
                # A^T: resident every step; tiny because rank is on sublanes.
                # (Could be single-buffered via pipeline_mode=pl.Buffered(1);
                #  left default since the block is only rank*in_dim*2 bytes.)
                pl.BlockSpec((rank, in_dim), lambda i, j: (0, 0)),
                # B: tiled over out_dim, lane-dense.
                pl.BlockSpec((rank, tn_eff), lambda i, j: (0, j)),
            ],
            out_specs=pl.BlockSpec((tm_eff, tn_eff), lambda i, j: (i, j)),
        ),
        compiler_params=pltpu.CompilerParams(
            dimension_semantics=("parallel", "parallel"),
            # Above the 16/32 MiB scoped defaults (v5e/v6e) to allow the large
            # tiles, but below v7x's 64 MiB physical VMEM.
            vmem_limit_bytes=48 * 1024 * 1024,
        ),
        interpret=interpret,
    )(xc, at, bc)

    # TODO(synk): for very large in_dim on v7x, add an "arbitrary" reduction
    # axis over in_dim with a (tm, rank) f32 accumulator to cap the x block.
    return out[:batch, :out_dim]


if __name__ == "__main__":
    # Small, deterministic setup consistent with LoRALayer(in_dim, out_dim, rank, alpha)
    batch, in_dim, out_dim, rank = 16, 32, 32, 8
    alpha = 4.0

    key = jax.random.PRNGKey(0)
    kx, ka, kb = jax.random.split(key, 3)

    x = jax.random.normal(kx, (batch, in_dim), dtype=jnp.float32)
    std_dev = 1.0 / jnp.sqrt(jnp.float32(rank))
    A = jax.random.normal(ka, (in_dim, rank), dtype=jnp.float32) * std_dev
    # NOTE: the PyTorch module inits B to zeros (output would be trivially zero);
    # use small deterministic random B here so the kernel math is actually exercised.
    B = 0.01 * jax.random.normal(kb, (rank, out_dim), dtype=jnp.float32)

    out = lora_forward(x, A, B, alpha)
    out = jax.block_until_ready(out)
    assert out.shape == (batch, out_dim)

    # Reference that emulates the kernel's bf16 MXU inputs + f32 accumulation.
    xb = x.astype(jnp.bfloat16).astype(jnp.float32)
    ab = A.astype(jnp.bfloat16).astype(jnp.float32)
    bb = B.astype(jnp.bfloat16).astype(jnp.float32)
    xa = (xb @ ab).astype(jnp.bfloat16).astype(jnp.float32)
    ref_bf16 = alpha * (xa @ bb)
    assert jnp.allclose(out, ref_bf16, atol=1e-4, rtol=1e-4)

    # Loose check against the exact f32 math of the PyTorch module.
    ref_f32 = alpha * (x @ A @ B)
    assert jnp.allclose(out, ref_f32, atol=5e-2, rtol=5e-2)

    print("KERNEL_OK")
</pallas_src>

<mosaic_0001>
module attributes {stable_mosaic.version = 11 : i64} {
  func.func @_lora_kernel(%arg0: i32, %arg1: i32, %arg2: memref<16x32xbf16, #tpu.memory_space<vmem>>, %arg3: memref<8x32xbf16, #tpu.memory_space<vmem>>, %arg4: memref<8x128xbf16, #tpu.memory_space<vmem>>, %arg5: memref<16x128xf32, #tpu.memory_space<vmem>>) attributes {dimension_semantics = [#tpu.dimension_semantics<parallel>, #tpu.dimension_semantics<parallel>], iteration_bounds = array<i64: 1, 1>, scalar_prefetch = 0 : i64, scratch_operands = 0 : i64, tpu.core_type = #tpu.core_type<tc>, window_params = [{transform_indices = @transform_0, window_bounds = array<i64: 16, 32>}, {pipeline_mode = #tpu.pipeline_mode<synchronous>, transform_indices = @transform_1, window_bounds = array<i64: 8, 32>}, {transform_indices = @transform_2, window_bounds = array<i64: 8, 128>}, {transform_indices = @transform_3, window_bounds = array<i64: 16, 128>}]} {
    %c0 = arith.constant 0 : index
    %c0_0 = arith.constant 0 : index
    %0 = vector.load %arg3[%c0, %c0_0] : memref<8x32xbf16, #tpu.memory_space<vmem>>, vector<8x32xbf16>
    %c0_1 = arith.constant 0 : index
    %c0_2 = arith.constant 0 : index
    %1 = vector.load %arg4[%c0_1, %c0_2] : memref<8x128xbf16, #tpu.memory_space<vmem>>, vector<8x128xbf16>
    %c0_i32 = arith.constant 0 : i32
    %c16_i32 = arith.constant 16 : i32
    %2 = arith.muli %c0_i32, %c16_i32 : i32
    %3 = tpu.assume_multiple %2, 16 : i32
    %4 = arith.index_cast %3 : i32 to index
    %c0_3 = arith.constant 0 : index
    %5 = vector.load %arg2[%4, %c0_3] : memref<16x32xbf16, #tpu.memory_space<vmem>>, vector<16x32xbf16>
    %cst = arith.constant dense<0.000000e+00> : vector<16x8xf32>
    %6 = tpu.matmul %5, %0, %cst {dimension_numbers = #tpu.dot_dimension_numbers<[1], [1], [0], [0], [0, 0, 1, 0], [], []>} : vector<16x32xbf16>, vector<8x32xbf16>, vector<16x8xf32> -> vector<16x8xf32>
    %7 = arith.truncf %6 : vector<16x8xf32> to vector<16x8xbf16>
    %cst_4 = arith.constant dense<0.000000e+00> : vector<16x128xf32>
    %8 = tpu.matmul %7, %1, %cst_4 {dimension_numbers = #tpu.dot_dimension_numbers<[1], [0], [0], [1], [0, 0, 1, 1], [], []>} : vector<16x8xbf16>, vector<8x128xbf16>, vector<16x128xf32> -> vector<16x128xf32>
    %cst_5 = arith.constant 4.000000e+00 : f32
    %9 = vector.broadcast %cst_5 : f32 to vector<16x128xf32>
    %10 = arith.mulf %9, %8 : vector<16x128xf32>
    %11 = arith.index_cast %3 : i32 to index
    %c0_6 = arith.constant 0 : index
    %12 = vector.load %arg5[%11, %c0_6] : memref<16x128xf32, #tpu.memory_space<vmem>>, vector<16x128xf32>
    tpu.vector_store %arg5[%11, %c0_6], %10 {strides = array<i32>} : memref<16x128xf32, #tpu.memory_space<vmem>>, vector<16x128xf32>,
    %c1_i32 = arith.constant 1 : i32
    return
  }
  func.func @transform_0(%arg0: i32, %arg1: i32) -> (i32, i32) {
    %c0_i32 = arith.constant 0 : i32
    %c0_i32_0 = arith.constant 0 : i32
    return %arg0, %c0_i32 : i32, i32
  }
  func.func @transform_1(%arg0: i32, %arg1: i32) -> (i32, i32) {
    %c0_i32 = arith.constant 0 : i32
    %c0_i32_0 = arith.constant 0 : i32
    %c0_i32_1 = arith.constant 0 : i32
    return %c0_i32, %c0_i32_0 : i32, i32
  }
  func.func @transform_2(%arg0: i32, %arg1: i32) -> (i32, i32) {
    %c0_i32 = arith.constant 0 : i32
    %c0_i32_0 = arith.constant 0 : i32
    return %c0_i32, %arg1 : i32, i32
  }
  func.func @transform_3(%arg0: i32, %arg1: i32) -> (i32, i32) {
    %c0_i32 = arith.constant 0 : i32
    return %arg0, %arg1 : i32, i32
  }
}

</mosaic_0001>

<bundles_post_ra>
// kernel: tpu_custom_call.1
= control target key start
LH: loop header
LB: loop body
LE: loop exit
PB: predicated region body
PF: predicated region fallthrough
CT: control target
= control target key end

     0   :  { %8 = vsyncpa [#allocation3], 0  ;;  %s340_s0 = inlined_call_operand.hbm [shape: bf16[16,32], index: 0, kind: input, shape index: {}]   ;;  %s341_s1 = inlined_call_operand.hbm [shape: bf16[8,32], index: 1, kind: input, shape index: {}]   ;;  %s342_s2 = inlined_call_operand.vmem [shape: bf16[8,128], index: 2, kind: input, shape index: {}]   ;;  %s343_s3 = inlined_call_operand.hbm [shape: f32[16,128], index: 3, kind: output, shape index: {}]  }
   0x1   :  { %9 = vsyncpa [#allocation6], 0 }
   0x2   :  { %10 = vsyncpa [#allocation4], 0  ;;  %s272_s12 = smov [#allocation2]   ;;  %s200_s16 = scalar_lea.hbm %s340_s0, 128 }
   0x3   :  { %s16_s13 = sshll.u32 %s272_s12, 4  ;;  %p201_p0 = scmp.ne.s32.totalorder %s340_s0, %s200_s16  ;;  %s17_s13 = int_to_ptr.vmem [resolvable:$true] %s16_s13 }
   0x4   :  { %p204_p1 = scmp.lt.u32.totalorder %s200_s16, %s340_s0 }
   0x6   :  { %p206_p2 = pnand %p204_p1, %p201_p0 }
   0x8   :  { %209 = shalt.err (!%p206_p2)
}
   0x9   :  { %s210_s21 = scalar_lea.vmem %s17_s13, 128  ;;  %p215_p4 = scmp.lt.s32.totalorder %s17_s13, %s17_s13 }
   0xa   :  { %p211_p3 = scmp.ne.s32.totalorder %s17_s13, %s210_s21  ;;  %p216_p5 = scmp.lt.s32.totalorder %s210_s21, %s210_s21 }
   0xc   :  { %p217_p6 = por %p216_p5, %p215_p4 }
   0xe   :  { %p218_p7 = pnand %p217_p6, %p211_p3 }
  0x10   :  { %221 = shalt.err (!%p218_p7)
}
  0x11   :  { %s273_s22 = smov 64   ;;  %s274_s23 = smov 4  }
  0x12   :  { %22 = dma.hbm_to_vmem [thread:$0]  %s340_s0, 128, %s17_s13, [#allocation3], %s273_s22, %s273_s22, %s274_s23  }
  0x13   :  { %s275_s26 = smov [#allocation5]   ;;  %s222_s30 = scalar_lea.hbm %s341_s1, 64 }
  0x14   :  { %s29_s27 = sshll.u32 %s275_s26, 4  ;;  %p223_p8 = scmp.ne.s32.totalorder %s341_s1, %s222_s30  ;;  %s30_s27 = int_to_ptr.vmem [resolvable:$true] %s29_s27 }
  0x15   :  { %p226_p9 = scmp.lt.u32.totalorder %s222_s30, %s341_s1 }
  0x17   :  { %p228_p10 = pnand %p226_p9, %p223_p8 }
  0x19   :  { %231 = shalt.err (!%p228_p10)
}
  0x1a   :  { %s232_s8 = scalar_lea.vmem %s30_s27, 64  ;;  %p237_p12 = scmp.lt.s32.totalorder %s30_s27, %s30_s27 }
  0x1b   :  { %p233_p11 = scmp.ne.s32.totalorder %s30_s27, %s232_s8  ;;  %p238_p13 = scmp.lt.s32.totalorder %s232_s8, %s232_s8 }
  0x1d   :  { %p239_p0 = por %p238_p13, %p237_p12 }
  0x1f   :  { %p240_p1 = pnand %p239_p0, %p233_p11 }
  0x21   :  { %243 = shalt.err (!%p240_p1)
}
  0x22   :  { %32 = dma.hbm_to_vmem [thread:$0]  %s341_s1, 64, %s30_s27, [#allocation6]  }
  0x23   :  { %266 = dma.done.wait [#allocation3], 128  }
  0x24   :  { %267 = vsyncadd [#allocation3], 4294967168 }
  0x25   :  { %268 = dma.done.wait [#allocation6], 64  }
  0x26   :  { %269 = vsyncadd [#allocation6], 4294967232  ;;  %v276_v0 = vmov 0.0   ;;  %vm277_vm0 = vmmov 0   ;;  %vm51_vm1 = vcmask 261120   ;;  %v199_v3 = vld [vmem:[#allocation2] sm:$0xff]  }
  0x27   :  { %178 = vmatprep.subr.bf16.mxu0 %v276_v0  ;;  %180 = vmatprep.mubr.msk.bf16.mxu0 %vm277_vm0, %v276_v0  ;;  %v42_v1 = vld [vmem:[#allocation5] sm:$0xf]  ;;  %v43_v4 = vld [vmem:[%s342_s2] sm:$0xf]  ;;  %vm104_vm2 = vcmask 1043456   ;;  %vm100_vm3 = vcmask 64512  }
  0x28   :  { %184 = vmatprep.subr.bf16.mxu1 %v276_v0  ;;  %186 = vmatprep.mubr.msk.bf16.mxu1 %vm277_vm0, %v276_v0  ;;  %v56_v2 = vsel %vm51_vm1, %v42_v1, 0  ;;  %v106_v5 = vsel %vm104_vm2, %v43_v4, 0  ;;  %s278_s1 = smov [#allocation7]  }
  0x29   :  { %179 = vmatpush3.bf16.xpose.msra.mxu0 %v56_v2  ;;  %185 = vmatpush3.bf16.msra.mxu1 %v106_v5  ;;  %s158_s12 = sshll.u32 %s278_s1, 4  ;;  %s159_s12 = int_to_ptr.vmem [resolvable:$true] %s158_s12 }
  0x2a   :  { %s244_s2 = scalar_lea.vmem %s159_s12, 256  ;;  %p249_p3 = scmp.lt.s32.totalorder %s159_s12, %s159_s12 }
  0x2b   :  { %p245_p2 = scmp.ne.s32.totalorder %s159_s12, %s244_s2  ;;  %p250_p4 = scmp.lt.s32.totalorder %s244_s2, %s244_s2 }
  0x2d   :  { %p251_p5 = por %p250_p4, %p249_p3 }
  0x2f   :  { %p252_p6 = pnand %p251_p5, %p245_p2 }
  0x30   :  { %181 = vmatmul.mubr.msk.bf16.vlgmr.msra.gmra.mrb[0].mxu0 %vm51_vm1, %v199_v3 }
 0x103   :  { %v92_v6 = vpop.f32.mrb[0].mxu0 }
 0x104   :  { %v182_v7 = vpop.f32.mrb[1].mxu0 }
 0x105   :  { %v95_v8 = vpop.f32.mrb[2].mxu0 }
 0x106   :  { %v99_v9 = vpack.c.bf16 %v95_v8, %v92_v6  ;;  %v183_v10 = vpop.f32.mrb[3].mxu0 }
 0x108   :  { %187 = vmatmul.mubr.msk.bf16.vlgmr.msra.gmra.mrb[0].mxu1 %vm100_vm3, %v99_v9 }
 0x1db   :  { %v142_v11 = vpop.f32.mrb[0].mxu1 }
 0x1dc   :  { %v149_v12 = vmul.f32 4.0, %v142_v11  ;;  %v188_v13 = vpop.f32.mrb[1].mxu1 }
 0x1dd   :  { %v145_v14 = vpop.f32.mrb[2].mxu1 }
 0x1de   :  { %151 = vst [vmem:[#allocation7] sm:$0xff] %v149_v12  ;;  %v150_v15 = vmul.f32 4.0, %v145_v14  ;;  %v189_v16 = vpop.f32.mrb[3].mxu1 }
 0x1e0   :  { %152 = vst [vmem:[#allocation7 + $0x8] sm:$0xff] %v150_v15 }
 0x1e1   :  { %255 = shalt.err (!%p252_p6)
}
 0x1e2   :  { %s256_s15 = scalar_lea.hbm %s343_s3, 256 }
 0x1e3   :  { %p257_p7 = scmp.ne.s32.totalorder %s343_s3, %s256_s15  ;;  %p260_p8 = scmp.lt.u32.totalorder %s256_s15, %s343_s3 }
 0x1e5   :  { %p262_p9 = pnand %p260_p8, %p257_p7 }
 0x1e7   :  { %265 = shalt.err (!%p262_p9)
}
 0x1e8   :  { %s279_s20 = smov 128   ;;  %s280_s21 = smov 8  }
 0x1e9   :  { %164 = dma.vmem_to_hbm [thread:$0]  %s159_s12, 256, %s343_s3, [#allocation4], %s279_s20, %s279_s20, %s280_s21  }
 0x1ea   :  { %270 = dma.done.wait [#allocation4], 256  }
 0x1eb   :  { %271 = vsyncadd [#allocation4], 4294967040 }
 0x1ec   :  { %168 = vsyncpa [#allocation3], 1 }
 0x1ed   :  { %169 = vsyncpa [#allocation6], 1 }
 0x1ee   :  { %170 = vsyncpa [#allocation4], 1 }

</bundles_post_ra>
